<compile_context>
chip_gen: v7x
topology: tpu7x:2x2x1
jax: 0.10.0
libtpu: 0.0.40
codegen_flags: <defaults>
</compile_context>

<pallas_src>
import math

import jax
import jax.numpy as jnp
from jax.experimental import pallas as pl
from jax.experimental.pallas import tpu as pltpu


def _sinusoidal_pos_emb_kernel(x_ref, w_ref, out_ref):
    # x_ref:   (tb, 1)            current batch tile of timesteps
    # w_ref:   (1, half_dim)      learned / random frequencies
    # out_ref: (tb, 2*half_dim+1)
    x = x_ref[...].astype(jnp.float32)                 # (tb, 1)
    w = w_ref[...].astype(jnp.float32)                 # (1, half_dim)
    freqs = x * w * (2.0 * math.pi)                    # (tb, half_dim), VPU
    # torch.cat((x, sin(freqs), cos(freqs)), dim=-1), assembled in-register and
    # written with a single full-block store.
    out_ref[...] = jnp.concatenate(
        [x, jnp.sin(freqs), jnp.cos(freqs)], axis=-1).astype(out_ref.dtype)


def _pick_tile_b(B, half_dim, out_dim, tile_b):
    """Largest sublane-aligned batch tile that fits a conservative VMEM budget."""
    if tile_b is not None:
        tb = max(8, tile_b - (tile_b % 8))
        return min(tb, max(8, B)) if B > tb else B
    # Per grid step (f32 bytes):
    #   2*tb*out_dim*4   double-buffered output block
    #   ~tb*out_dim*4    concat temporary
    #   ~3*tb*half_dim*4 freqs / sin / cos temporaries
    #   2*tb*1*4         double-buffered x block
    bytes_per_row = 4 * (3 * out_dim + 3 * half_dim + 2)
    vmem_budget = 8 * 1024 * 1024          # fits scoped defaults on v5e/v6e/v7x
    cap = max(8, (vmem_budget // bytes_per_row) // 8 * 8)
    cap = min(cap, 8192)                   # keep >=2 parallel steps for huge B (v7x megacore)
    if B <= cap:
        return B                           # single step; block == full array dims
    return cap


def random_or_learned_sinusoidal_pos_emb(x, weights, *, tile_b=None):
    """x: (B,) timesteps, weights: (half_dim,). Returns (B, 2*half_dim + 1) f32.

    `is_random` in the PyTorch module only toggles requires_grad on `weights`;
    the forward pass is identical, so it needs no flag here.
    """
    assert x.ndim == 1 and weights.ndim == 1
    B = x.shape[0]
    half_dim = weights.shape[0]
    out_dim = 2 * half_dim + 1

    tb = _pick_tile_b(B, half_dim, out_dim, tile_b)

    x2 = x.astype(jnp.float32).reshape(B, 1)
    w2 = weights.astype(jnp.float32).reshape(1, half_dim)

    return pl.pallas_call(
        _sinusoidal_pos_emb_kernel,
        out_shape=jax.ShapeDtypeStruct((B, out_dim), jnp.float32),
        grid=(pl.cdiv(B, tb),),             # ragged last block masked by Pallas
        in_specs=[
            pl.BlockSpec((tb, 1), lambda i: (i, 0)),
            pl.BlockSpec((1, half_dim), lambda i: (0, 0)),
        ],
        out_specs=pl.BlockSpec((tb, out_dim), lambda i: (i, 0)),
        compiler_params=pltpu.CompilerParams(
            dimension_semantics=("parallel",)),
    )(x2, w2)


def _reference(x, weights):
    """Plain-JAX replica of the PyTorch forward pass."""
    x2 = x.astype(jnp.float32)[:, None]
    freqs = x2 * weights.astype(jnp.float32)[None, :] * 2.0 * math.pi
    return jnp.concatenate([x2, jnp.sin(freqs), jnp.cos(freqs)], axis=-1)


if __name__ == "__main__":
    key = jax.random.PRNGKey(0)
    k1, k2 = jax.random.split(key)

    B, dim = 8, 32                      # module requires dim % 2 == 0
    half_dim = dim // 2

    # Diffusion-style timesteps in [0, 1), random (or learned) frequencies.
    x = jax.random.uniform(k1, (B,), jnp.float32, minval=0.0, maxval=1.0)
    weights = jax.random.normal(k2, (half_dim,), jnp.float32)

    out = random_or_learned_sinusoidal_pos_emb(x, weights)
    out = jax.block_until_ready(out)
    assert out.shape == (B, dim + 1), out.shape

    ref = _reference(x, weights)
    max_err = float(jnp.max(jnp.abs(out - ref)))
    assert max_err < 1e-5, f"mismatch vs reference: {max_err}"

    print("KERNEL_OK")
</pallas_src>

<mosaic_0001>
module attributes {stable_mosaic.version = 11 : i64} {
  func.func @_sinusoidal_pos_emb_kernel(%arg0: i32, %arg1: memref<8x1xf32, #tpu.memory_space<vmem>>, %arg2: memref<1x16xf32, #tpu.memory_space<vmem>>, %arg3: memref<8x33xf32, #tpu.memory_space<vmem>>) attributes {dimension_semantics = [#tpu.dimension_semantics<parallel>], iteration_bounds = array<i64: 1>, scalar_prefetch = 0 : i64, scratch_operands = 0 : i64, tpu.core_type = #tpu.core_type<tc>, window_params = [{transform_indices = @transform_0, window_bounds = array<i64: 8, 1>}, {pipeline_mode = #tpu.pipeline_mode<synchronous>, transform_indices = @transform_1, window_bounds = array<i64: 1, 16>}, {transform_indices = @transform_2, window_bounds = array<i64: 8, 33>}]} {
    %c0 = arith.constant 0 : index
    %c0_0 = arith.constant 0 : index
    %0 = vector.load %arg1[%c0, %c0_0] : memref<8x1xf32, #tpu.memory_space<vmem>>, vector<8x1xf32>
    %c0_1 = arith.constant 0 : index
    %c0_2 = arith.constant 0 : index
    %1 = vector.load %arg2[%c0_1, %c0_2] : memref<1x16xf32, #tpu.memory_space<vmem>>, vector<1x16xf32>
    %2 = vector.broadcast %0 : vector<8x1xf32> to vector<8x16xf32>
    %3 = vector.broadcast %1 : vector<1x16xf32> to vector<8x16xf32>
    %4 = arith.mulf %2, %3 : vector<8x16xf32>
    %cst = arith.constant 6.28318548 : f32
    %5 = vector.broadcast %cst : f32 to vector<8x16xf32>
    %6 = arith.mulf %4, %5 : vector<8x16xf32>
    %7 = math.sin %6 : vector<8x16xf32>
    %8 = math.cos %6 : vector<8x16xf32>
    %9 = tpu.concatenate %0, %7, %8 in 1 : vector<8x1xf32>, vector<8x16xf32>, vector<8x16xf32> -> vector<8x33xf32>
    %c0_3 = arith.constant 0 : index
    %c0_4 = arith.constant 0 : index
    %10 = vector.load %arg3[%c0_3, %c0_4] : memref<8x33xf32, #tpu.memory_space<vmem>>, vector<8x33xf32>
    tpu.vector_store %arg3[%c0_3, %c0_4], %9 {strides = array<i32>} : memref<8x33xf32, #tpu.memory_space<vmem>>, vector<8x33xf32>,
    return
  }
  func.func @transform_0(%arg0: i32) -> (i32, i32) {
    %c0_i32 = arith.constant 0 : i32
    %c0_i32_0 = arith.constant 0 : i32
    return %arg0, %c0_i32 : i32, i32
  }
  func.func @transform_1(%arg0: i32) -> (i32, i32) {
    %c0_i32 = arith.constant 0 : i32
    %c0_i32_0 = arith.constant 0 : i32
    %c0_i32_1 = arith.constant 0 : i32
    return %c0_i32, %c0_i32_0 : i32, i32
  }
  func.func @transform_2(%arg0: i32) -> (i32, i32) {
    %c0_i32 = arith.constant 0 : i32
    %c0_i32_0 = arith.constant 0 : i32
    return %arg0, %c0_i32 : i32, i32
  }
}

</mosaic_0001>

<bundles_post_ra>
// kernel: tpu_custom_call.1
= control target key start
LH: loop header
LB: loop body
LE: loop exit
PB: predicated region body
PF: predicated region fallthrough
CT: control target
= control target key end

     0   :  { %v314_v1 = vmov 0   ;;  %s382_s0 = inlined_call_operand.vmem [shape: f32[8,1], index: 0, kind: input, shape index: {}]   ;;  %s383_s1 = inlined_call_operand.vmem [shape: f32[1,16], index: 1, kind: input, shape index: {}]   ;;  %s384_s2 = inlined_call_operand.hbm [shape: f32[8,33], index: 2, kind: output, shape index: {}]  }
   0x1   :  { %v342_v0 = vld [vmem:[%s382_s0] sm:$0xff]  ;;  %285 = vset.pattern.permute.xlu0 %v314_v1 }
   0x2   :  { %7 = vsyncpa [#allocation3], 0  ;;  %16 = vperm.xlu0 %285, %v342_v0   ;;  %v262_v2 = vld [vmem:[%s383_s1] ss:$0 sm:$0xff]  ;;  %v315_v17 = vmov 2102212464  }
   0x3   :  { %v316_v19 = vmov 920167782   ;;  %v317_v23 = vmov 1326507024   ;;  %v318_v25 = vmov 683565275  }
   0x4   :  { %v319_v27 = vmov 2475754826   ;;  %v320_v30 = vmov 2131351028   ;;  %s321_s0 = smov 17   ;;  %s322_s1 = smov 1  }
   0x5   :  { %s323_s13 = smov [#allocation2]  }
   0x6   :  { %s254_s14 = sshll.u32 %s323_s13, 4  ;;  %s255_s14 = int_to_ptr.vmem [resolvable:$true] %s254_s14 }
   0x7   :  { %s290_s15 = scalar_lea.vmem %s255_s14, 128  ;;  %p295_p1 = scmp.lt.s32.totalorder %s255_s14, %s255_s14 }
   0x8   :  { %p291_p0 = scmp.ne.s32.totalorder %s255_s14, %s290_s15  ;;  %p296_p2 = scmp.lt.s32.totalorder %s290_s15, %s290_s15 }
   0xa   :  { %p297_p3 = por %p296_p2, %p295_p1 }
   0xc   :  { %p298_p4 = pnand %p297_p3, %p291_p0 }
  0x81   :  { %v17_v3 = vpop.permute.xlu0 %16 }
  0x82   :  { %v25_v4 = vmul.f32 %v262_v2, %v17_v3 }
  0x84   :  { %v348_v5 = vmul.f32 6.2831855, %v25_v4 }
  0x86   :  { %v30_v6 = vand.u32 2139095040, %v348_v5  ;;  %v27_v7 = vand.u32 2147483647, %v348_v5  ;;  %vm29_vm7 = vcmp.lt.s32.totalorder %v348_v5, 0  ;;  %vm119_vm15 = vweird.f32 %v348_v5 }
  0x88   :  { %v31_v8 = vshrl.u32 %v30_v6, 23  ;;  %v34_v10 = vand.u32 8388607, %v27_v7  ;;  %vm28_vm8 = vcmp.le.f32.partialorder %v27_v7, 0.7853982 }
  0x8a   :  { %v263_v9 = vadd.s32 4294967169, %v31_v8  ;;  %v35_v13 = vor.u32 8388608, %v34_v10 }
  0x8c   :  { %v37_v11 = vadd.s32 1, %v263_v9  ;;  %v75_v21 = vshll.u32 %v35_v13, 8 }
  0x8e   :  { %vm38_vm0 = vcmp.gt.s32.totalorder %v37_v11, 0 }
  0x8f   :  { %v39_v12 = vsel %vm38_vm0, %v37_v11, 0  ;;  %vm242_vm0 = vcmask 7168  }
  0x90   :  { %v41_v14 = vand.u32 31, %v39_v12  ;;  %v40_v15 = vshrl.u32 %v39_v12, 5 }
  0x92   :  { %v42_v16 = vsub.s32 32, %v41_v14  ;;  %v53_v18 = vshll.u32 %v315_v17, %v41_v14  ;;  %v56_v20 = vshll.u32 %v316_v19, %v41_v14  ;;  %v44_v26 = vshll.u32 %v318_v25, %v41_v14 }
  0x93   :  { %v47_v29 = vshll.u32 %v319_v27, %v41_v14  ;;  %v50_v32 = vshll.u32 %v320_v30, %v41_v14  ;;  %vm62_vm1 = vcmp.lt.s32.totalorder %v40_v15, 4  ;;  %vm59_vm2 = vcmp.lt.s32.totalorder %v40_v15, 1 }
  0x94   :  { %v54_v22 = vshrl.u32 %v316_v19, %v42_v16  ;;  %v57_v24 = vshrl.u32 %v317_v23, %v42_v16  ;;  %v45_v28 = vshrl.u32 %v319_v27, %v42_v16  ;;  %v48_v31 = vshrl.u32 %v320_v30, %v42_v16 }
  0x95   :  { %v51_v33 = vshrl.u32 %v315_v17, %v42_v16  ;;  %v43_v37 = vshrl.u32 %v318_v25, %v42_v16  ;;  %vm60_vm3 = vcmp.lt.s32.totalorder %v40_v15, 2  ;;  %vm61_vm4 = vcmp.lt.s32.totalorder %v40_v15, 3 }
  0x96   :  { %v55_v34 = vor.u32 %v54_v22, %v53_v18  ;;  %v58_v35 = vor.u32 %v57_v24, %v56_v20  ;;  %v46_v36 = vor.u32 %v45_v28, %v44_v26  ;;  %v49_v38 = vor.u32 %v48_v31, %v47_v29 }
  0x97   :  { %v52_v39 = vor.u32 %v51_v33, %v50_v32 }
  0x98   :  { %v68_v40 = vsel %vm62_vm1, %v55_v34, 920167782  ;;  %v72_v41 = vsel %vm62_vm1, %v58_v35, 1326507024  ;;  %v67_v43 = vsel %vm59_vm2, %v46_v36, %v49_v38  ;;  %v63_v46 = vsel %vm59_vm2, %v43_v37, %v46_v36 }
  0x99   :  { %v64_v42 = vsel %vm62_vm1, %v52_v39, 2102212464  ;;  %v69_v44 = vsel %vm61_vm4, %v52_v39, %v68_v40  ;;  %v71_v45 = vsel %vm59_vm2, %v49_v38, %v52_v39  ;;  %v73_v49 = vsel %vm61_vm4, %v55_v34, %v72_v41 }
  0x9a   :  { %v65_v47 = vsel %vm61_vm4, %v49_v38, %v64_v42  ;;  %v70_v48 = vsel %vm60_vm3, %v67_v43, %v69_v44  ;;  %v74_v50 = vsel %vm60_vm3, %v71_v45, %v73_v49  ;;  %vm244_vm1 = vcmask 138240  }
  0x9b   :  { %v354_v51 = vmul.u32.u64.low %v75_v21, %v70_v48  ;;  %v355_v52 = vmul.u32.u64.high %v75_v21, %v70_v48, %v354_v51  ;;  %v357_v53 = vmul.u32.u64.low %v75_v21, %v74_v50  ;;  %v358_v54 = vmul.u32.u64.high %v75_v21, %v74_v50, %v357_v53 }
  0x9c   :  { %v66_v55 = vsel %vm60_vm3, %v63_v46, %v65_v47  ;;  %vm246_vm2 = vcmask 269312  }
  0x9d   :  { %v85_v56 = vadd.s32 1, %v355_v52  ;;  %v82_v57 = vmul.u32 %v75_v21, %v66_v55  ;;  %vm84_vm5 = vc.u32 %v358_v54, %v354_v51  ;;  %v83_v8 = vadd.s32 %v354_v51, %v358_v54 }
  0x9f   :  { %v86_v58 = vsel %vm84_vm5, %v85_v56, %v355_v52 }
  0xa0   :  { %v87_v59 = vadd.s32 %v86_v58, %v82_v57 }
  0xa2   :  { %v88_v60 = vadd.s32 536870912, %v87_v59 }
  0xa4   :  { %v89_v61 = vshrl.u32 %v88_v60, 30 }
  0xa6   :  { %v90_v62 = vshll.u32 %v89_v61, 30  ;;  %v113_v20 = vsub.s32 4, %v89_v61 }
  0xa8   :  { %v91_v63 = vsub.s32 %v87_v59, %v90_v62  ;;  %v114_v23 = vsel %vm29_vm7, %v113_v20, %v89_v61 }
  0xa9   :  { %v116_v25 = vsel %vm28_vm8, 0, %v114_v23 }
  0xaa   :  { %v93_v1 = vsub.s32 0, %v91_v63  ;;  %v120_v26 = vadd.s32 3, %v116_v25  ;;  %v224_v27 = vand.u32 3, %v116_v25 }
  0xac   :  { %v264_v2 = vmin.u32 %v93_v1, %v91_v63  ;;  %v121_v28 = vand.u32 3, %v120_v26  ;;  %vm229_vm9 = vcmp.eq.s32.totalorder %v224_v27, 2  ;;  %vm226_vm11 = vcmp.eq.s32.totalorder %v224_v27, 0 }
  0xad   :  { %vm225_vm13 = vcmp.lt.s32.totalorder %v224_v27, 2 }
  0xae   :  { %v95_v3 = vclz %v264_v2  ;;  %vm126_vm10 = vcmp.eq.s32.totalorder %v121_v28, 2  ;;  %vm123_vm12 = vcmp.eq.s32.totalorder %v121_v28, 0  ;;  %vm122_vm14 = vcmp.lt.s32.totalorder %v121_v28, 2 }
  0xb0   :  { %v265_v4 = vadd.s32 4294967294, %v95_v3 }
  0xb2   :  { %vm266_vm6 = vcmp.lt.s32.totalorder %v265_v4, 0 }
  0xb3   :  { %v98_v6 = vsel %vm266_vm6, 0, %v265_v4 }
  0xb4   :  { %v99_v9 = vsub.s32 32, %v98_v6  ;;  %v103_v10 = vsub.s32 4294967266, %v98_v6  ;;  %v100_v11 = vshll.u32 %v91_v63, %v98_v6 }
  0xb6   :  { %v101_v12 = vshrl.u32 %v83_v8, %v99_v9  ;;  %v104_v13 = vadd.s32 127, %v103_v10 }
  0xb8   :  { %v102_v14 = vor.u32 %v101_v12, %v100_v11  ;;  %v105_v15 = vshll.u32 %v104_v13, 23 }
  0xba   :  { %v106_v16 = vor.u32 4788187, %v105_v15  ;;  %v109_v18 = vcvt.s32.f32 %v102_v14 }
  0xbc   :  { %v107_v17 = vand.u32 2147483647, %v106_v16 }
  0xbe   :  { %v110_v19 = vmul.f32 %v109_v18, %v107_v17 }
  0xc0   :  { %v111_v21 = vxor.u32 2147483648, %v110_v19 }
  0xc2   :  { %v112_v22 = vsel %vm29_vm7, %v111_v21, %v110_v19 }
  0xc3   :  { %v115_v24 = vsel %vm28_vm8, %v348_v5, %v112_v22 }
  0xc4   :  { %286 = vcosq.f32 %v115_v24 }
  0xc5   :  { %288 = vsinq.f32 %v115_v24 }
  0xce   :  { %v287_v29 = vpop.eup %286 }
  0xcf   :  { %v289_v30 = vpop.eup %288  ;;  %v127_v31 = vxor.u32 2147483648, %v287_v29 }
  0xd0   :  { %v124_v32 = vxor.u32 2147483648, %v289_v30 }
  0xd1   :  { %v231_v33 = vsel %vm229_vm9, %v127_v31, %v289_v30  ;;  %v128_v7 = vsel %vm126_vm10, %v127_v31, %v289_v30 }
  0xd2   :  { %v228_v34 = vsel %vm226_vm11, %v287_v29, %v124_v32  ;;  %v125_v35 = vsel %vm123_vm12, %v287_v29, %v124_v32 }
  0xd3   :  { %v232_v36 = vsel %vm225_vm13, %v228_v34, %v231_v33  ;;  %v129_v37 = vsel %vm122_vm14, %v125_v35, %v128_v7 }
  0xd4   :  { %v233_v38 = vsel %vm119_vm15, nan, %v232_v36  ;;  %v130_v39 = vsel %vm119_vm15, nan, %v129_v37 }
  0xd5   :  { %239 = vrot.lane.b32.xlu1 %v233_v38, %s321_s0  ;;  %235 = vrot.lane.b32.xlu0 %v130_v39, %s322_s1 }
 0x147   :  { %v240_v40 = vpop.permute.xlu1 %239  ;;  %v236_v41 = vpop.permute.xlu0 %235 }
 0x148   :  { %v243_v42 = vsel %vm242_vm0, %v342_v0, %v236_v41 }
 0x149   :  { %v245_v43 = vsel %vm244_vm1, %v243_v42, %v240_v40 }
 0x14a   :  { %247 = vst.msk [vmem:[#allocation2] sm:$0xff] %vm246_vm2, %v245_v43 }
 0x14b   :  { %301 = shalt.err (!%p298_p4)
}
 0x14c   :  { %s302_s18 = scalar_lea.hbm %s384_s2, 128 }
 0x14d   :  { %p303_p5 = scmp.ne.s32.totalorder %s384_s2, %s302_s18  ;;  %p306_p6 = scmp.lt.u32.totalorder %s302_s18, %s384_s2 }
 0x14f   :  { %p308_p7 = pnand %p306_p6, %p303_p5 }
 0x151   :  { %311 = shalt.err (!%p308_p7)
}
 0x152   :  { %257 = dma.vmem_to_hbm [thread:$0]  %s255_s14, 128, %s384_s2, [#allocation3]  }
 0x153   :  { %312 = dma.done.wait [#allocation3], 128  }
 0x154   :  { %313 = vsyncadd [#allocation3], 4294967168 }
 0x155   :  { %261 = vsyncpa [#allocation3], 1 }

</bundles_post_ra>
